<compile_context>
chip_gen: v7x
topology: tpu7x:2x2x1
jax: 0.10.0
libtpu: 0.0.40
codegen_flags: <defaults>
</compile_context>

<pallas_src>
import functools

import jax
import jax.numpy as jnp
from jax.experimental import pallas as pl
from jax.experimental.pallas import tpu as pltpu

LEAKY_SLOPE = 0.01   # nn.LeakyReLU default
BN_EPS = 1e-5        # nn.BatchNorm2d default


def _vmem_spec():
    return pl.BlockSpec(memory_space=pltpu.MemorySpace.VMEM)


def _round_up(x, m):
    return ((x + m - 1) // m) * m


# ----------------------------- fused Pallas kernel -----------------------------

def _fused_kernel(*refs, has_rest, n, f_pad, m_total, n_pad_pos):
    """Whole CNN1 forward on full-VMEM operands.

    pe/po/pr : (16, n*pad) bf16 im2col patches (taps on sublanes, per-sample
               lane-padded flattened positions on lanes), split by conv-output
               row parity; pr (pool leftover rows) only feeds the BN stats.
    w        : (16, 16) bf16 conv weight (taps zero-padded 12->16).
    pp       : (16, 8) f32 packed params: [:,0]=conv bias, [:,1]=BN gamma,
               [:,2]=BN beta, [0,3]=head bias.
    wh       : (16, f_pad) f32 head weight (zero in padded lanes).
    o        : (1, n) f32 sigmoid(logits).
    """
    if has_rest:
        pe_ref, po_ref, pr_ref, w_ref, pp_ref, wh_ref, o_ref = refs
    else:
        pe_ref, po_ref, w_ref, pp_ref, wh_ref, o_ref = refs
        pr_ref = None

    w = w_ref[...]
    pp = pp_ref[...]
    b = pp[:, 0:1]
    g = pp[:, 1:2]
    be = pp[:, 2:3]
    bh = pp[0:1, 3:4]

    def conv_act(p_ref):
        h = jnp.dot(w, p_ref[...], preferred_element_type=jnp.float32) + b
        return jnp.maximum(h, LEAKY_SLOPE * h)            # LeakyReLU (max form)

    h_e = conv_act(pe_ref)                                # (16, n*f_pad) even rows
    h_o = conv_act(po_ref)                                # (16, n*f_pad) odd  rows

    # Training-mode BatchNorm statistics (biased variance, single-pass
    # sum / sum-of-squares) over all N*Ho*Wo conv-output positions.
    s1 = jnp.sum(h_e, axis=1, keepdims=True) + jnp.sum(h_o, axis=1, keepdims=True)
    s2 = (jnp.sum(h_e * h_e, axis=1, keepdims=True)
          + jnp.sum(h_o * h_o, axis=1, keepdims=True))
    if has_rest:
        h_r = conv_act(pr_ref)                            # rows the pool drops
        s1 = s1 + jnp.sum(h_r, axis=1, keepdims=True)
        s2 = s2 + jnp.sum(h_r * h_r, axis=1, keepdims=True)

    # Zero-padded lane positions activate to exactly LeakyReLU(bias); subtract
    # their known contribution instead of masking every element.
    act_b = jnp.maximum(b, LEAKY_SLOPE * b)
    s1 = s1 - float(n_pad_pos) * act_b
    s2 = s2 - float(n_pad_pos) * (act_b * act_b)

    inv_m = 1.0 / float(m_total)
    mean = s1 * inv_m
    var = jnp.maximum(s2 * inv_m - mean * mean, 0.0)      # biased variance
    scale = g * jax.lax.rsqrt(var + BN_EPS)               # (16, 1)
    shift = be - mean * scale

    # BatchNorm affine then MaxPool2d((2,1)).  Shift is hoisted out of the max;
    # scale is NOT (gamma can be negative, which would flip the max).
    p_max = jnp.maximum(h_e * scale, h_o * scale) + shift           # (16, n*f_pad)

    # Linear head + sigmoid: per-sample reduction over aligned 128-lane blocks
    # (padded lanes contribute 0 because wh is zero there).
    wh = wh_ref[...]                                                # (16, f_pad)
    parts = []
    for s in range(n):
        blk = p_max[:, s * f_pad:(s + 1) * f_pad]                   # (16, f_pad)
        csum = jnp.sum(blk * wh, axis=0, keepdims=True)             # (1, f_pad)
        parts.append(jnp.sum(csum, axis=1, keepdims=True))          # (1, 1)
    logits = jnp.concatenate(parts, axis=1) + bh                    # (1, n)
    o_ref[...] = 1.0 / (1.0 + jnp.exp(-logits))                     # exact sigmoid


# ------------------------------ wrapper / params -------------------------------

def out_dims(height_pixels, n_periods):
    w_in = n_periods * 3
    ho = (height_pixels - 4) // 2 + 1       # conv (4,3), stride (2,1), 'valid'
    wo = w_in - 2
    hp = ho // 2                            # maxpool (2,1), floor
    return ho, wo, hp, 16 * hp * wo


def init_params(key, height_pixels, n_periods):
    _, wo, hp, dim = out_dims(height_pixels, n_periods)
    ks = jax.random.split(key, 6)
    # NOTE on porting real PyTorch weights into this layout:
    #   conv weight (16, 1, 4, 3) -> .reshape(16, 12)
    #   conv bias / BN gamma / BN beta (16,) -> .reshape(16, 1)
    #   head weight (1, dim)      -> .reshape(16, hp * wo)
    #   head bias (1,)            -> .reshape(1, 1)
    return {
        "w":  jax.random.normal(ks[0], (16, 12), jnp.float32) * 0.2,
        "b":  jax.random.normal(ks[1], (16, 1), jnp.float32) * 0.1,
        "g":  1.0 + jax.random.normal(ks[2], (16, 1), jnp.float32) * 0.1,
        "be": jax.random.normal(ks[3], (16, 1), jnp.float32) * 0.1,
        "wh": jax.random.normal(ks[4], (16, hp * wo), jnp.float32) * 0.05,
        "bh": jax.random.normal(ks[5], (1, 1), jnp.float32) * 0.05,
    }


def cnn1_forward(x_nchw, params):
    # PyTorch NCHW input, in_channels == 1.
    x = x_nchw[:, 0, :, :].astype(jnp.float32)           # (N, H, W)
    n, h, w_in = x.shape
    ho = (h - 4) // 2 + 1
    wo = w_in - 2
    hp = ho // 2
    f = hp * wo                                           # pooled positions / sample
    f_pad = _round_up(max(f, 1), 128)                     # lane-align per sample
    has_rest = (ho % 2 == 1)
    r = wo if has_rest else 0                             # leftover conv-row positions
    r_pad = _round_up(max(r, 1), 128) if has_rest else 0
    m_total = n * ho * wo                                 # BN statistics population
    n_pad_pos = 2 * n * (f_pad - f) + (n * (r_pad - r) if has_rest else 0)

    # im2col taps built directly per conv-output-row parity (no full (12,N,Ho,Wo)
    # intermediate re-sliced afterwards).  tap k = (i, j), k = i*3 + j matches
    # the PyTorch (16,1,4,3).reshape(16,12) weight layout.
    def taps(start_row, rows, stride):
        cols = []
        for i in range(4):
            for j in range(3):
                lim = start_row + i + stride * (rows - 1) + 1
                cols.append(jax.lax.slice(x, (0, start_row + i, j),
                                          (n, lim, j + wo), (1, stride, 1)))
        return jnp.stack(cols, axis=0).reshape(12, n, rows * wo)

    def pack(t, width, pad_to):
        # zero-pad taps 12->16 and lanes width->pad_to, flatten batch into lanes.
        t = jnp.pad(t, ((0, 4), (0, 0), (0, pad_to - width)))
        return t.reshape(16, n * pad_to).astype(jnp.bfloat16)

    pe = pack(taps(0, hp, 4), f, f_pad)                   # even conv rows
    po = pack(taps(2, hp, 4), f, f_pad)                   # odd  conv rows

    # Packed parameters: one bf16 matmul operand + one (16, 8) per-channel block.
    w16 = jnp.pad(params["w"], ((0, 0), (0, 4))).astype(jnp.bfloat16)    # (16, 16)
    pp = jnp.concatenate([params["b"], params["g"], params["be"],
                          jnp.broadcast_to(params["bh"], (16, 1)),
                          jnp.zeros((16, 4), jnp.float32)], axis=1)      # (16, 8)
    wh = jnp.pad(params["wh"], ((0, 0), (0, f_pad - f)))                 # (16, f_pad)

    inputs = [pe, po]
    if has_rest:
        inputs.append(pack(taps(4 * hp, 1, 1), r, r_pad))  # leftover rows (BN only)
    inputs += [w16, pp, wh]

    # Explicit VMEM budget: scoped defaults are 16/32 MiB and v7x physical VMEM
    # is 64 MiB, so size the limit from the actual operands (with headroom).
    op_bytes = sum(int(a.size) * a.dtype.itemsize for a in inputs) + 4 * n
    vmem_limit = int(min(max(2 * op_bytes + (4 << 20), 16 << 20), 60 << 20))

    out = pl.pallas_call(
        functools.partial(_fused_kernel, has_rest=has_rest, n=n, f_pad=f_pad,
                          m_total=m_total, n_pad_pos=n_pad_pos),
        out_shape=jax.ShapeDtypeStruct((1, n), jnp.float32),
        in_specs=[_vmem_spec()] * len(inputs),
        out_specs=_vmem_spec(),
        compiler_params=pltpu.CompilerParams(vmem_limit_bytes=vmem_limit),
    )(*inputs)
    return jnp.squeeze(out)                               # matches torch .squeeze()


if __name__ == "__main__":
    n_periods, height_pixels = 8, 16                      # input width = n_periods*3 = 24
    key = jax.random.PRNGKey(0)
    pkey, xkey = jax.random.split(key)
    params = init_params(pkey, height_pixels, n_periods)

    x = jax.random.normal(xkey, (2, 1, height_pixels, n_periods * 3), jnp.float32)

    fwd = jax.jit(lambda a: cnn1_forward(a, params))
    out = fwd(x)
    jax.block_until_ready(out)
    assert out.shape == (2,), out.shape
    print("KERNEL_OK")
</pallas_src>

<mosaic_0001>
module attributes {stable_mosaic.version = 11 : i64} {
  func.func @_fused_kernel(%arg0: memref<16x256xbf16, #tpu.memory_space<vmem>>, %arg1: memref<16x256xbf16, #tpu.memory_space<vmem>>, %arg2: memref<16x256xbf16, #tpu.memory_space<vmem>>, %arg3: memref<16x16xbf16, #tpu.memory_space<vmem>>, %arg4: memref<16x8xf32, #tpu.memory_space<vmem>>, %arg5: memref<16x128xf32, #tpu.memory_space<vmem>>, %arg6: memref<1x2xf32, #tpu.memory_space<vmem>>) attributes {dimension_semantics = [], scalar_prefetch = 0 : i64, scratch_operands = 0 : i64, tpu.core_type = #tpu.core_type<tc>} {
    %c0 = arith.constant 0 : index
    %c0_0 = arith.constant 0 : index
    %0 = vector.load %arg3[%c0, %c0_0] : memref<16x16xbf16, #tpu.memory_space<vmem>>, vector<16x16xbf16>
    %c0_1 = arith.constant 0 : index
    %c0_2 = arith.constant 0 : index
    %1 = vector.load %arg4[%c0_1, %c0_2] : memref<16x8xf32, #tpu.memory_space<vmem>>, vector<16x8xf32>
    %2 = vector.extract_strided_slice %1 {offsets = [0, 0], sizes = [16, 1], strides = [1, 1]} : vector<16x8xf32> to vector<16x1xf32>
    %3 = vector.extract_strided_slice %1 {offsets = [0, 1], sizes = [16, 1], strides = [1, 1]} : vector<16x8xf32> to vector<16x1xf32>
    %4 = vector.extract_strided_slice %1 {offsets = [0, 2], sizes = [16, 1], strides = [1, 1]} : vector<16x8xf32> to vector<16x1xf32>
    %5 = vector.extract_strided_slice %1 {offsets = [0, 3], sizes = [1, 1], strides = [1, 1]} : vector<16x8xf32> to vector<1x1xf32>
    %c0_3 = arith.constant 0 : index
    %c0_4 = arith.constant 0 : index
    %6 = vector.load %arg0[%c0_3, %c0_4] : memref<16x256xbf16, #tpu.memory_space<vmem>>, vector<16x256xbf16>
    %cst = arith.constant dense<0.000000e+00> : vector<16x256xf32>
    %7 = tpu.matmul %0, %6, %cst {dimension_numbers = #tpu.dot_dimension_numbers<[1], [0], [0], [1], [0, 0, 1, 1], [], []>} : vector<16x16xbf16>, vector<16x256xbf16>, vector<16x256xf32> -> vector<16x256xf32>
    %8 = vector.broadcast %2 : vector<16x1xf32> to vector<16x256xf32>
    %9 = arith.addf %7, %8 : vector<16x256xf32>
    %cst_5 = arith.constant 0.00999999977 : f32
    %10 = vector.broadcast %cst_5 : f32 to vector<16x256xf32>
    %11 = arith.mulf %10, %9 : vector<16x256xf32>
    %12 = arith.maximumf %9, %11 : vector<16x256xf32>
    %c0_6 = arith.constant 0 : index
    %c0_7 = arith.constant 0 : index
    %13 = vector.load %arg1[%c0_6, %c0_7] : memref<16x256xbf16, #tpu.memory_space<vmem>>, vector<16x256xbf16>
    %cst_8 = arith.constant dense<0.000000e+00> : vector<16x256xf32>
    %14 = tpu.matmul %0, %13, %cst_8 {dimension_numbers = #tpu.dot_dimension_numbers<[1], [0], [0], [1], [0, 0, 1, 1], [], []>} : vector<16x16xbf16>, vector<16x256xbf16>, vector<16x256xf32> -> vector<16x256xf32>
    %15 = vector.broadcast %2 : vector<16x1xf32> to vector<16x256xf32>
    %16 = arith.addf %14, %15 : vector<16x256xf32>
    %cst_9 = arith.constant 0.00999999977 : f32
    %17 = vector.broadcast %cst_9 : f32 to vector<16x256xf32>
    %18 = arith.mulf %17, %16 : vector<16x256xf32>
    %19 = arith.maximumf %16, %18 : vector<16x256xf32>
    %cst_10 = arith.constant dense<0.000000e+00> : vector<16xf32>
    %20 = vector.multi_reduction <add>, %12, %cst_10 [1] : vector<16x256xf32> to vector<16xf32>
    %21 = vector.shape_cast %20 : vector<16xf32> to vector<16x1xf32>
    %cst_11 = arith.constant dense<0.000000e+00> : vector<16xf32>
    %22 = vector.multi_reduction <add>, %19, %cst_11 [1] : vector<16x256xf32> to vector<16xf32>
    %23 = vector.shape_cast %22 : vector<16xf32> to vector<16x1xf32>
    %24 = arith.addf %21, %23 : vector<16x1xf32>
    %25 = arith.mulf %12, %12 : vector<16x256xf32>
    %cst_12 = arith.constant dense<0.000000e+00> : vector<16xf32>
    %26 = vector.multi_reduction <add>, %25, %cst_12 [1] : vector<16x256xf32> to vector<16xf32>
    %27 = vector.shape_cast %26 : vector<16xf32> to vector<16x1xf32>
    %28 = arith.mulf %19, %19 : vector<16x256xf32>
    %cst_13 = arith.constant dense<0.000000e+00> : vector<16xf32>
    %29 = vector.multi_reduction <add>, %28, %cst_13 [1] : vector<16x256xf32> to vector<16xf32>
    %30 = vector.shape_cast %29 : vector<16xf32> to vector<16x1xf32>
    %31 = arith.addf %27, %30 : vector<16x1xf32>
    %c0_14 = arith.constant 0 : index
    %c0_15 = arith.constant 0 : index
    %32 = vector.load %arg2[%c0_14, %c0_15] : memref<16x256xbf16, #tpu.memory_space<vmem>>, vector<16x256xbf16>
    %cst_16 = arith.constant dense<0.000000e+00> : vector<16x256xf32>
    %33 = tpu.matmul %0, %32, %cst_16 {dimension_numbers = #tpu.dot_dimension_numbers<[1], [0], [0], [1], [0, 0, 1, 1], [], []>} : vector<16x16xbf16>, vector<16x256xbf16>, vector<16x256xf32> -> vector<16x256xf32>
    %34 = vector.broadcast %2 : vector<16x1xf32> to vector<16x256xf32>
    %35 = arith.addf %33, %34 : vector<16x256xf32>
    %cst_17 = arith.constant 0.00999999977 : f32
    %36 = vector.broadcast %cst_17 : f32 to vector<16x256xf32>
    %37 = arith.mulf %36, %35 : vector<16x256xf32>
    %38 = arith.maximumf %35, %37 : vector<16x256xf32>
    %cst_18 = arith.constant dense<0.000000e+00> : vector<16xf32>
    %39 = vector.multi_reduction <add>, %38, %cst_18 [1] : vector<16x256xf32> to vector<16xf32>
    %40 = vector.shape_cast %39 : vector<16xf32> to vector<16x1xf32>
    %41 = arith.addf %24, %40 : vector<16x1xf32>
    %42 = arith.mulf %38, %38 : vector<16x256xf32>
    %cst_19 = arith.constant dense<0.000000e+00> : vector<16xf32>
    %43 = vector.multi_reduction <add>, %42, %cst_19 [1] : vector<16x256xf32> to vector<16xf32>
    %44 = vector.shape_cast %43 : vector<16xf32> to vector<16x1xf32>
    %45 = arith.addf %31, %44 : vector<16x1xf32>
    %cst_20 = arith.constant 0.00999999977 : f32
    %46 = vector.broadcast %cst_20 : f32 to vector<16x1xf32>
    %47 = arith.mulf %46, %2 : vector<16x1xf32>
    %48 = arith.maximumf %2, %47 : vector<16x1xf32>
    %cst_21 = arith.constant 4.600000e+02 : f32
    %49 = vector.broadcast %cst_21 : f32 to vector<16x1xf32>
    %50 = arith.mulf %49, %48 : vector<16x1xf32>
    %51 = arith.subf %41, %50 : vector<16x1xf32>
    %52 = arith.mulf %48, %48 : vector<16x1xf32>
    %cst_22 = arith.constant 4.600000e+02 : f32
    %53 = vector.broadcast %cst_22 : f32 to vector<16x1xf32>
    %54 = arith.mulf %53, %52 : vector<16x1xf32>
    %55 = arith.subf %45, %54 : vector<16x1xf32>
    %cst_23 = arith.constant 0.00324675324 : f32
    %56 = vector.broadcast %cst_23 : f32 to vector<16x1xf32>
    %57 = arith.mulf %51, %56 : vector<16x1xf32>
    %cst_24 = arith.constant 0.00324675324 : f32
    %58 = vector.broadcast %cst_24 : f32 to vector<16x1xf32>
    %59 = arith.mulf %55, %58 : vector<16x1xf32>
    %60 = arith.mulf %57, %57 : vector<16x1xf32>
    %61 = arith.subf %59, %60 : vector<16x1xf32>
    %cst_25 = arith.constant 0.000000e+00 : f32
    %62 = vector.broadcast %cst_25 : f32 to vector<16x1xf32>
    %63 = arith.maximumf %61, %62 : vector<16x1xf32>
    %cst_26 = arith.constant 9.99999974E-6 : f32
    %64 = vector.broadcast %cst_26 : f32 to vector<16x1xf32>
    %65 = arith.addf %63, %64 : vector<16x1xf32>
    %66 = math.rsqrt %65 : vector<16x1xf32>
    %67 = arith.mulf %3, %66 : vector<16x1xf32>
    %68 = arith.mulf %57, %67 : vector<16x1xf32>
    %69 = arith.subf %4, %68 : vector<16x1xf32>
    %70 = vector.broadcast %67 : vector<16x1xf32> to vector<16x256xf32>
    %71 = arith.mulf %12, %70 : vector<16x256xf32>
    %72 = vector.broadcast %67 : vector<16x1xf32> to vector<16x256xf32>
    %73 = arith.mulf %19, %72 : vector<16x256xf32>
    %74 = arith.maximumf %71, %73 : vector<16x256xf32>
    %75 = vector.broadcast %69 : vector<16x1xf32> to vector<16x256xf32>
    %76 = arith.addf %74, %75 : vector<16x256xf32>
    %c0_27 = arith.constant 0 : index
    %c0_28 = arith.constant 0 : index
    %77 = vector.load %arg5[%c0_27, %c0_28] : memref<16x128xf32, #tpu.memory_space<vmem>>, vector<16x128xf32>
    %78 = vector.extract_strided_slice %76 {offsets = [0, 0], sizes = [16, 128], strides = [1, 1]} : vector<16x256xf32> to vector<16x128xf32>
    %79 = arith.mulf %78, %77 : vector<16x128xf32>
    %cst_29 = arith.constant dense<0.000000e+00> : vector<128xf32>
    %80 = vector.multi_reduction <add>, %79, %cst_29 [0] : vector<16x128xf32> to vector<128xf32>
    %81 = vector.shape_cast %80 : vector<128xf32> to vector<1x128xf32>
    %cst_30 = arith.constant dense<0.000000e+00> : vector<1xf32>
    %82 = vector.multi_reduction <add>, %81, %cst_30 [1] : vector<1x128xf32> to vector<1xf32>
    %83 = vector.shape_cast %82 : vector<1xf32> to vector<1x1xf32>
    %84 = vector.extract_strided_slice %76 {offsets = [0, 128], sizes = [16, 128], strides = [1, 1]} : vector<16x256xf32> to vector<16x128xf32>
    %85 = arith.mulf %84, %77 : vector<16x128xf32>
    %cst_31 = arith.constant dense<0.000000e+00> : vector<128xf32>
    %86 = vector.multi_reduction <add>, %85, %cst_31 [0] : vector<16x128xf32> to vector<128xf32>
    %87 = vector.shape_cast %86 : vector<128xf32> to vector<1x128xf32>
    %cst_32 = arith.constant dense<0.000000e+00> : vector<1xf32>
    %88 = vector.multi_reduction <add>, %87, %cst_32 [1] : vector<1x128xf32> to vector<1xf32>
    %89 = vector.shape_cast %88 : vector<1xf32> to vector<1x1xf32>
    %90 = tpu.concatenate %83, %89 in 1 : vector<1x1xf32>, vector<1x1xf32> -> vector<1x2xf32>
    %91 = vector.broadcast %5 : vector<1x1xf32> to vector<1x2xf32>
    %92 = arith.addf %90, %91 : vector<1x2xf32>
    %cst_33 = arith.constant 0.000000e+00 : f32
    %93 = vector.broadcast %cst_33 : f32 to vector<1x2xf32>
    %94 = arith.subf %93, %92 : vector<1x2xf32>
    %95 = math.exp %94 : vector<1x2xf32>
    %cst_34 = arith.constant 1.000000e+00 : f32
    %96 = vector.broadcast %cst_34 : f32 to vector<1x2xf32>
    %97 = arith.addf %96, %95 : vector<1x2xf32>
    %cst_35 = arith.constant 1.000000e+00 : f32
    %98 = vector.broadcast %cst_35 : f32 to vector<1x2xf32>
    %99 = arith.divf %98, %97 : vector<1x2xf32>
    %c0_36 = arith.constant 0 : index
    %c0_37 = arith.constant 0 : index
    %100 = vector.load %arg6[%c0_36, %c0_37] : memref<1x2xf32, #tpu.memory_space<vmem>>, vector<1x2xf32>
    tpu.vector_store %arg6[%c0_36, %c0_37], %99 {strides = array<i32>} : memref<1x2xf32, #tpu.memory_space<vmem>>, vector<1x2xf32>,
    return
  }
}

</mosaic_0001>

<bundles_post_ra>
// kernel: _lambda_.1
= control target key start
LH: loop header
LB: loop body
LE: loop exit
PB: predicated region body
PF: predicated region fallthrough
CT: control target
= control target key end

     0   :  { %v505_v2 = vmov 0   ;;  %vm56_vm0 = vcmask 130048   ;;  %s656_s0 = inlined_call_operand.vmem [shape: bf16[16,256], index: 0, kind: input, shape index: {}]   ;;  %s657_s1 = inlined_call_operand.vmem [shape: bf16[16,256], index: 1, kind: input, shape index: {}]   ;;  %s658_s2 = inlined_call_operand.vmem [shape: bf16[16,256], index: 2, kind: input, shape index: {}]   ;;  %s659_s3 = inlined_call_operand.vmem [shape: bf16[16,16], index: 3, kind: input, shape index: {}]   ;;  %s660_s4 = inlined_call_operand.vmem [shape: f32[16,8], index: 4, kind: input, shape index: {}]   ;;  %s661_s5 = inlined_call_operand.vmem [shape: f32[16,128], index: 5, kind: input, shape index: {}]   ;;  %s662_s6 = inlined_call_operand.hbm [shape: f32[1,2], index: 6, kind: output, shape index: {}]  }
   0x1   :  { %v463_v0 = vld [vmem:[%s656_s0 + $0x4] ss:$8 sps:$4 sm:$0xff]   ;;  %92 = vmatprep.mubr.bf16.mxu0 %v505_v2  ;;  %155 = vmatprep.mubr.bf16.mxu1 %v505_v2  ;;  %v467_v3 = vld [vmem:[%s656_s0] ss:$8 sps:$4 sm:$0xff]  }
   0x2   :  { %v465_v1 = vld [vmem:[%s657_s1 + $0x4] ss:$8 sps:$4 sm:$0xff]   ;;  %60 = vmatprep.subr.bf16.mxu0 %v463_v0  ;;  %v468_v4 = vld [vmem:[%s657_s1] ss:$8 sps:$4 sm:$0xff]   ;;  %456 = vset.pattern.permute.xlu0 %v505_v2 }
   0x3   :  { %123 = vmatprep.subr.bf16.mxu1 %v465_v1  ;;  %v469_v5 = vld [vmem:[%s659_s3] sm:$0xff]   ;;  %61 = vmatpush1.bf16.msra.mxu0 %v467_v3 }
   0x4   :  { %124 = vmatpush1.bf16.msra.mxu1 %v468_v4  ;;  %v470_v6 = vld [vmem:[%s658_s2] ss:$8 sps:$4 sm:$0xff]   ;;  %v472_v7 = vld [vmem:[%s658_s2 + $0x4] ss:$8 sps:$4 sm:$0xff]  }
   0x5   :  { %v572_v8 = vld [vmem:[%s660_s4] sm:$0xff] }
   0x6   :  { %11 = vsyncpa [#allocation3], 0  ;;  %222 = vmatprep.subr.bf16.mxu0 %v472_v7  ;;  %33 = vperm.xlu0 %456, %v572_v8   ;;  %v578_v9 = vld [vmem:[%s660_s4 + $0x8] sm:$0xff]  ;;  %s506_s2 = smov 1   ;;  %s508_s4 = smov 127   ;;  %vm409_vm1 = vcmask 7168  }
   0x7   :  { %441 = vmatmul.mubr.msk.bf16.vlgmr.msra.gmra.mrb[0].mxu0 %vm56_vm0, %v469_v5  ;;  %444 = vmatmul.mubr.msk.bf16.vlgmr.msra.gmra.mrb[0].mxu1 %vm56_vm0, %v469_v5  ;;  %s509_s12 = smov 2   ;;  %vm422_vm2 = vcmask 8192  }
   0x8   :  { %223 = vmatpush1.bf16.msra.mxu0 %v470_v6  ;;  %254 = vmatprep.mubr.bf16.mxu0 %v505_v2 }
   0xa   :  { %38 = vperm.xlu0 %456, %v578_v9  }
   0xf   :  { %447 = vmatmul.mubr.msk.bf16.vlgmr.msra.gmra.mrb[4].mxu0 %vm56_vm0, %v469_v5 }
  0x85   :  { %v34_v10 = vpop.permute.xlu0 %33 }
  0x89   :  { %v39_v11 = vpop.permute.xlu0 %38 }
  0xda   :  { %v94_v12 = vpop.f32.mrb[0].mxu0  ;;  %v157_v13 = vpop.f32.mrb[0].mxu1 }
  0xdb   :  { %v95_v14 = vadd.f32 %v94_v12, %v34_v10  ;;  %v158_v15 = vadd.f32 %v157_v13, %v34_v10  ;;  %v96_v16 = vpop.f32.mrb[1].mxu0  ;;  %v159_v17 = vpop.f32.mrb[1].mxu1 }
  0xdc   :  { %v97_v18 = vadd.f32 %v96_v16, %v34_v10  ;;  %v160_v19 = vadd.f32 %v159_v17, %v34_v10  ;;  %v98_v20 = vpop.f32.mrb[2].mxu0  ;;  %v161_v21 = vpop.f32.mrb[2].mxu1 }
  0xdd   :  { %v103_v22 = vmul.f32 0.01, %v95_v14  ;;  %v166_v23 = vmul.f32 0.01, %v158_v15  ;;  %v99_v24 = vadd.f32 %v98_v20, %v39_v11  ;;  %v162_v25 = vadd.f32 %v161_v21, %v39_v11  ;;  %v100_v26 = vpop.f32.mrb[3].mxu0  ;;  %v163_v27 = vpop.f32.mrb[3].mxu1 }
  0xde   :  { %v104_v28 = vmul.f32 0.01, %v97_v18  ;;  %v167_v29 = vmul.f32 0.01, %v160_v19  ;;  %v101_v30 = vadd.f32 %v100_v26, %v39_v11  ;;  %v164_v31 = vadd.f32 %v163_v27, %v39_v11 }
  0xdf   :  { %v581_v32 = vmax.f32 %v95_v14, %v103_v22  ;;  %v583_v33 = vmax.f32 %v158_v15, %v166_v23  ;;  %v105_v34 = vmul.f32 0.01, %v99_v24  ;;  %v168_v38 = vmul.f32 0.01, %v162_v25 }
  0xe0   :  { %v585_v35 = vmax.f32 %v97_v18, %v104_v28  ;;  %v587_v36 = vmax.f32 %v160_v19, %v167_v29  ;;  %v106_v37 = vmul.f32 0.01, %v101_v30  ;;  %v169_v39 = vmul.f32 0.01, %v164_v31 }
  0xe1   :  { %v589_v40 = vmax.f32 %v99_v24, %v105_v34  ;;  %v597_v49 = vmax.f32 %v162_v25, %v168_v38  ;;  %v188_v62 = vmul.f32 %v581_v32, %v581_v32  ;;  %v198_v13 = vmul.f32 %v583_v33, %v583_v33 }
  0xe2   :  { %v591_v41 = vmax.f32 %v101_v30, %v106_v37  ;;  %v256_v42 = vpop.f32.mrb[4].mxu0  ;;  %v180_v43 = vadd.f32 %v587_v36, %v583_v33  ;;  %v174_v44 = vadd.f32 %v585_v35, %v581_v32  ;;  %v599_v53 = vmax.f32 %v164_v31, %v169_v39 }
  0xe3   :  { %v257_v45 = vadd.f32 %v256_v42, %v34_v10  ;;  %v258_v46 = vpop.f32.mrb[5].mxu0  ;;  %v189_v63 = vmul.f32 %v585_v35, %v585_v35  ;;  %v199_v14 = vmul.f32 %v587_v36, %v587_v36  ;;  %v190_v16 = vmul.f32 %v589_v40, %v589_v40 }
  0xe4   :  { %v259_v47 = vadd.f32 %v258_v46, %v34_v10  ;;  %181 = vadd.xlane.f32.xlu0 %v180_v43  ;;  %v260_v48 = vpop.f32.mrb[6].mxu0  ;;  %175 = vadd.xlane.f32.xlu1 %v174_v44  ;;  %v177_v56 = vadd.f32 %v591_v41, %v589_v40  ;;  %v183_v2 = vadd.f32 %v599_v53, %v597_v49  ;;  %v294_v27 = vmul.f32 0.01, %v578_v9 }
  0xe5   :  { %v265_v50 = vmul.f32 0.01, %v257_v45  ;;  %v261_v51 = vadd.f32 %v260_v48, %v39_v11  ;;  %v262_v52 = vpop.f32.mrb[7].mxu0  ;;  %v192_v12 = vadd.f32 %v189_v63, %v188_v62  ;;  %v202_v15 = vadd.f32 %v199_v14, %v198_v13 }
  0xe6   :  { %v266_v54 = vmul.f32 0.01, %v259_v47  ;;  %v263_v55 = vadd.f32 %v262_v52, %v39_v11  ;;  %v191_v17 = vmul.f32 %v591_v41, %v591_v41  ;;  %v200_v19 = vmul.f32 %v597_v49, %v597_v49 }
  0xe7   :  { %v269_v57 = vmax.f32 %v257_v45, %v265_v50  ;;  %v267_v58 = vmul.f32 0.01, %v261_v51  ;;  %v201_v20 = vmul.f32 %v599_v53, %v599_v53  ;;  %v293_v29 = vmul.f32 0.01, %v572_v8 }
  0xe8   :  { %v270_v59 = vmax.f32 %v259_v47, %v266_v54  ;;  %v268_v60 = vmul.f32 0.01, %v263_v55  ;;  %178 = vadd.xlane.f32.xlu1 %v177_v56  ;;  %v195_v18 = vadd.f32 %v191_v17, %v190_v16  ;;  %v296_v30 = vmax.f32 %v578_v9, %v294_v27 }
  0xe9   :  { %v271_v61 = vmax.f32 %v261_v51, %v267_v58  ;;  %v281_v0 = vmul.f32 %v269_v57, %v269_v57  ;;  %v205_v21 = vadd.f32 %v201_v20, %v200_v19  ;;  %v295_v37 = vmax.f32 %v572_v8, %v293_v29 }
  0xea   :  { %v272_v1 = vmax.f32 %v263_v55, %v268_v60  ;;  %v273_v3 = vadd.f32 %v270_v59, %v269_v57  ;;  %v282_v4 = vmul.f32 %v270_v59, %v270_v59  ;;  %v302_v38 = vmul.f32 %v296_v30, %v296_v30 }
  0xeb   :  { %v283_v5 = vmul.f32 %v271_v61, %v271_v61  ;;  %v297_v44 = vmul.f32 460.0, %v295_v37  ;;  %v298_v51 = vmul.f32 460.0, %v296_v30  ;;  %v301_v52 = vmul.f32 %v295_v37, %v295_v37 }
  0xec   :  { %184 = vadd.xlane.f32.xlu1 %v183_v2  ;;  %v284_v6 = vmul.f32 %v272_v1, %v272_v1  ;;  %v276_v7 = vadd.f32 %v272_v1, %v271_v61  ;;  %v285_v10 = vadd.f32 %v282_v4, %v281_v0  ;;  %v304_v47 = vmul.f32 460.0, %v302_v38 }
  0xed   :  { %v303_v60 = vmul.f32 460.0, %v301_v52  ;;  %v507_v16 = vmov 1   ;;  %v511_v30 = vmov 3  }
  0xee   :  { %v288_v11 = vadd.f32 %v284_v6, %v283_v5  ;;  %457 = vset.pattern.permute.xlu0 %v507_v16  ;;  %458 = vset.pattern.permute.xlu1 %v507_v16 }
  0xf0   :  { %289 = vadd.xlane.f32.xlu0 %v288_v11  ;;  %193 = vadd.xlane.f32.xlu1 %v192_v12 }
  0xf4   :  { %203 = vadd.xlane.f32.xlu1 %v202_v15 }
  0xf8   :  { %196 = vadd.xlane.f32.xlu1 %v195_v18 }
  0xfc   :  { %206 = vadd.xlane.f32.xlu1 %v205_v21 }
 0x100   :  { %274 = vadd.xlane.f32.xlu1 %v273_v3 }
 0x104   :  { %277 = vadd.xlane.f32.xlu1 %v276_v7 }
 0x108   :  { %286 = vadd.xlane.f32.xlu1 %v285_v10 }
 0x171   :  { %v176_v22 = vpop.xlane.xlu1 %175  ;;  %v182_v31 = vpop.xlane.xlu0 %181 }
 0x172   :  { %v186_v39 = vadd.f32 %v182_v31, %v176_v22 }
 0x175   :  { %v179_v23 = vpop.xlane.xlu1 %178 }
 0x179   :  { %v185_v24 = vpop.xlane.xlu1 %184 }
 0x17a   :  { %v187_v48 = vadd.f32 %v185_v24, %v179_v23 }
 0x17d   :  { %v194_v25 = vpop.xlane.xlu1 %193  ;;  %v290_v46 = vpop.xlane.xlu0 %289 }
 0x181   :  { %v204_v26 = vpop.xlane.xlu1 %203 }
 0x182   :  { %v208_v57 = vadd.f32 %v204_v26, %v194_v25  ;;  %v510_v25 = vmov 2  }
 0x185   :  { %v197_v28 = vpop.xlane.xlu1 %196 }
 0x189   :  { %v207_v34 = vpop.xlane.xlu1 %206 }
 0x18a   :  { %v209_v42 = vadd.f32 %v207_v34, %v197_v28 }
 0x18c   :  { %v292_v50 = vadd.f32 %v290_v46, %v209_v42 }
 0x18d   :  { %v275_v43 = vpop.xlane.xlu1 %274 }
 0x18e   :  { %v279_v45 = vadd.f32 %v275_v43, %v186_v39  ;;  %v306_v58 = vsub.f32 %v292_v50, %v304_v47 }
 0x190   :  { %v299_v55 = vsub.f32 %v279_v45, %v297_v44  ;;  %v310_v1 = vmul.f32 0.0032467532, %v306_v58 }
 0x191   :  { %v278_v54 = vpop.xlane.xlu1 %277 }
 0x192   :  { %v280_v56 = vadd.f32 %v278_v54, %v187_v48  ;;  %v307_v62 = vmul.f32 0.0032467532, %v299_v55 }
 0x194   :  { %v300_v59 = vsub.f32 %v280_v56, %v298_v51  ;;  %v311_v4 = vmul.f32 %v307_v62, %v307_v62 }
 0x195   :  { %v287_v61 = vpop.xlane.xlu1 %286 }
 0x196   :  { %v308_v63 = vmul.f32 0.0032467532, %v300_v59  ;;  %v291_v0 = vadd.f32 %v287_v61, %v208_v57 }
 0x198   :  { %v312_v2 = vmul.f32 %v308_v63, %v308_v63  ;;  %v305_v3 = vsub.f32 %v291_v0, %v303_v60 }
 0x19a   :  { %v314_v5 = vsub.f32 %v310_v1, %v312_v2  ;;  %v309_v6 = vmul.f32 0.0032467532, %v305_v3 }
 0x19c   :  { %v316_v7 = vmax.f32 %v314_v5, 0.0  ;;  %v313_v10 = vsub.f32 %v309_v6, %v311_v4 }
 0x19e   :  { %v318_v11 = vadd.f32 1e-05, %v316_v7  ;;  %v315_v12 = vmax.f32 %v313_v10, 0.0 }
 0x1a0   :  { %473 = vrsqrt.f32 %v318_v11  ;;  %v317_v13 = vadd.f32 1e-05, %v315_v12 }
 0x1a2   :  { %475 = vrsqrt.f32 %v317_v13 }
 0x1aa   :  { %v474_v14 = vpop.eup %473 }
 0x1ab   :  { %325 = vrot.lane.b32.xlu0 %v474_v14, %s506_s2 }
 0x1ac   :  { %v476_v15 = vpop.eup %475 }
 0x1ad   :  { %323 = vrot.lane.b32.xlu1 %v476_v15, %s506_s2 }
 0x21d   :  { %v326_v19 = vpop.permute.xlu0 %325 }
 0x21e   :  { %v330_v20 = vmul.f32 %v326_v19, %v578_v9 }
 0x21f   :  { %v324_v17 = vpop.permute.xlu1 %323 }
 0x220   :  { %v329_v18 = vmul.f32 %v324_v17, %v572_v8 }
 0x222   :  { %333 = vrot.lane.b32.xlu1 %v329_v18, %s508_s4 }
 0x226   :  { %335 = vrot.lane.b32.xlu1 %v330_v20, %s508_s4 }
 0x294   :  { %v334_v21 = vpop.permute.xlu1 %333 }
 0x295   :  { %v339_v22 = vmul.f32 %v334_v21, %v307_v62 }
 0x297   :  { %343 = vrot.lane.b32.xlu0 %v339_v22, %s509_s12 }
 0x298   :  { %v336_v23 = vpop.permute.xlu1 %335 }
 0x299   :  { %v340_v24 = vmul.f32 %v336_v23, %v308_v63 }
 0x29b   :  { %352 = vperm.xlu0 %457, %v329_v18   ;;  %345 = vrot.lane.b32.xlu1 %v340_v24, %s509_s12 }
 0x29f   :  { %356 = vperm.xlu1 %458, %v330_v20   ;;  %460 = vset.pattern.permute.xlu0 %v510_v25 }
 0x2a3   :  { %459 = vset.pattern.permute.xlu1 %v510_v25 }
 0x309   :  { %v344_v26 = vpop.permute.xlu0 %343 }
 0x30a   :  { %v349_v27 = vsub.f32 %v572_v8, %v344_v26 }
 0x30c   :  { %373 = vperm.xlu1 %459, %v349_v27  }
 0x30d   :  { %v346_v28 = vpop.permute.xlu1 %345 }
 0x30e   :  { %v350_v29 = vsub.f32 %v578_v9, %v346_v28 }
 0x310   :  { %378 = vperm.xlu0 %460, %v350_v29   ;;  %461 = vset.pattern.permute.xlu1 %v511_v30 }
 0x314   :  { %462 = vset.pattern.permute.xlu0 %v511_v30 }
 0x31a   :  { %v353_v31 = vpop.permute.xlu0 %352 }
 0x31b   :  { %v359_v37 = vmul.f32 %v353_v31, %v581_v32  ;;  %v360_v38 = vmul.f32 %v353_v31, %v585_v35  ;;  %v363_v39 = vmul.f32 %v353_v31, %v583_v33  ;;  %v364_v42 = vmul.f32 %v353_v31, %v587_v36  ;;  %v385_v33 = vld [vmem:[%s661_s5] sm:$0xff]  ;;  %v386_v35 = vld [vmem:[%s661_s5 + $0x8] sm:$0xff]  ;;  %s512_s5 = smov [#allocation2]  }
 0x31c   :  { %s430_s17 = sshll.u32 %s512_s5, 4  ;;  %s431_s17 = int_to_ptr.vmem [resolvable:$true] %s430_s17 }
 0x31d   :  { %v367_v47 = vmax.f32 %v359_v37, %v363_v39  ;;  %v368_v48 = vmax.f32 %v360_v38, %v364_v42  ;;  %s481_s18 = scalar_lea.vmem %s431_s17, 16  ;;  %s485_s19 = scalar_lea.vmem %s431_s17, 32 }
 0x31e   :  { %v357_v34 = vpop.permute.xlu1 %356  ;;  %p482_p0 = scmp.ne.s32.totalorder %s431_s17, %s481_s18  ;;  %p486_p1 = scmp.lt.s32.totalorder %s431_s17, %s431_s17 }
 0x31f   :  { %v361_v43 = vmul.f32 %v357_v34, %v589_v40  ;;  %v362_v44 = vmul.f32 %v357_v34, %v591_v41  ;;  %v365_v9 = vmul.f32 %v357_v34, %v597_v49  ;;  %v366_v45 = vmul.f32 %v357_v34, %v599_v53  ;;  %p487_p2 = scmp.lt.s32.totalorder %s485_s19, %s481_s18 }
 0x321   :  { %v369_v32 = vmax.f32 %v361_v43, %v365_v9  ;;  %v370_v52 = vmax.f32 %v362_v44, %v366_v45  ;;  %p488_p3 = por %p487_p2, %p486_p1 }
 0x323   :  { %p489_p4 = pnand %p488_p3, %p482_p0 }
 0x38b   :  { %v374_v46 = vpop.permute.xlu1 %373 }
 0x38c   :  { %v381_v50 = vadd.f32 %v374_v46, %v367_v47  ;;  %v382_v51 = vadd.f32 %v374_v46, %v368_v48 }
 0x38e   :  { %v387_v49 = vmul.f32 %v385_v33, %v381_v50  ;;  %v398_v53 = vmul.f32 %v385_v33, %v382_v51 }
 0x38f   :  { %v379_v36 = vpop.permute.xlu0 %378 }
 0x390   :  { %v383_v40 = vadd.f32 %v379_v36, %v369_v32  ;;  %v384_v41 = vadd.f32 %v379_v36, %v370_v52 }
 0x392   :  { %v388_v54 = vmul.f32 %v386_v35, %v383_v40  ;;  %v399_v55 = vmul.f32 %v386_v35, %v384_v41 }
 0x394   :  { %v389_v56 = vadd.f32 %v388_v54, %v387_v49  ;;  %v400_v57 = vadd.f32 %v399_v55, %v398_v53 }
 0x396   :  { %v401_v58 = vrot.slane %v400_v57, 4  ;;  %v390_v59 = vrot.slane %v389_v56, 4 }
 0x398   :  { %v402_v60 = vadd.f32 %v401_v58, %v400_v57  ;;  %v391_v61 = vadd.f32 %v390_v59, %v389_v56 }
 0x39a   :  { %v403_v62 = vrot.slane %v402_v60, 2  ;;  %v392_v63 = vrot.slane %v391_v61, 2 }
 0x39c   :  { %v404_v0 = vadd.f32 %v403_v62, %v402_v60  ;;  %v393_v1 = vadd.f32 %v392_v63, %v391_v61 }
 0x39e   :  { %v405_v2 = vrot.slane %v404_v0, 1  ;;  %v394_v3 = vrot.slane %v393_v1, 1 }
 0x3a0   :  { %v406_v4 = vadd.f32 %v405_v2, %v404_v0  ;;  %v395_v5 = vadd.f32 %v394_v3, %v393_v1 }
 0x3a2   :  { %407 = vadd.xlane.f32.xlu0 %v406_v4  ;;  %396 = vadd.xlane.f32.xlu1 %v395_v5 }
 0x3b3   :  { %412 = vperm.xlu1 %461, %v572_v8  }
 0x42f   :  { %v397_v6 = vpop.xlane.xlu1 %396  ;;  %v408_v7 = vpop.xlane.xlu0 %407 }
 0x430   :  { %v410_v10 = vsel %vm409_vm1, %v397_v6, %v408_v7 }
 0x433   :  { %v413_v11 = vpop.permute.xlu1 %412 }
 0x434   :  { %v415_v12 = vadd.f32 %v413_v11, %v410_v10 }
 0x436   :  { %v416_v13 = vsub.f32 0.0, %v415_v12 }
 0x438   :  { %v417_v14 = vmul.f32 1.442695, %v416_v13 }
 0x43a   :  { %477 = vpow2.f32 %v417_v14 }
 0x444   :  { %v478_v15 = vpop.eup %477 }
 0x445   :  { %v419_v16 = vadd.f32 1.0, %v478_v15 }
 0x447   :  { %479 = vrcp.f32 %v419_v16 }
 0x451   :  { %v480_v17 = vpop.eup %479 }
 0x452   :  { %423 = vst.msk [vmem:[#allocation2] sm:$0x1] %vm422_vm2, %v480_v17 }
 0x453   :  { %492 = shalt.err (!%p489_p4)
}
 0x454   :  { %s493_s22 = scalar_lea.hbm %s662_s6, 16 }
 0x455   :  { %p494_p5 = scmp.ne.s32.totalorder %s662_s6, %s493_s22  ;;  %p497_p6 = scmp.lt.u32.totalorder %s493_s22, %s662_s6 }
 0x457   :  { %p499_p7 = pnand %p497_p6, %p494_p5 }
 0x459   :  { %502 = shalt.err (!%p499_p7)
}
 0x45a   :  { %433 = dma.vmem_to_hbm [thread:$0]  %s431_s17, 16, %s662_s6, [#allocation3]  }
 0x45b   :  { %503 = dma.done.wait [#allocation3], 16  }
 0x45c   :  { %504 = vsyncadd [#allocation3], 4294967280 }
 0x45d   :  { %437 = vsyncpa [#allocation3], 1 }

</bundles_post_ra>
